<compile_context>
chip_gen: v6e
topology: v6e:2x2x1
jax: 0.10.0
libtpu: 0.0.40
codegen_flags: <defaults>
</compile_context>

<pallas_src>
import jax
import jax.numpy as jnp
import numpy as np
from jax.experimental import pallas as pl
from jax.experimental.pallas import tpu as pltpu


def _make_kernel(B, C, L, NC, D):
    m = float(C * (L - 2))          # valid 2nd-difference sample count per signal
    inv_n = 1.0 / float(D)          # 1 / (C*L) for the mse term

    def kernel(labels_ref, x_ref, wbt_ref, bbig_ref, mask_ref, cmap_ref,
               back0_ref, loss_ref, back_ref):
        # ---- Denoiser: one lane-dense MXU pass for the whole batch --------
        x = x_ref[...]                                            # (B, D)
        noise = jnp.dot(x, wbt_ref[...],
                        preferred_element_type=jnp.float32) + bbig_ref[...]
        signal = x - noise                                        # (B, D)

        # ---- SignalSmoothLoss (loss4): stateless, fully batched ------------
        # Centered 2nd difference sig[p-1] - 2*sig[p] + sig[p+1]; invalid
        # cross-channel lane positions are masked out.  One-pass variance.
        d2 = (pltpu.roll(signal, shift=1, axis=1)
              + pltpu.roll(signal, shift=D - 1, axis=1)
              - 2.0 * signal) * mask_ref[...]                     # (B, D)
        s1 = jnp.sum(d2, axis=1, keepdims=True)                   # (B, 1)
        s2 = jnp.sum(d2 * d2, axis=1, keepdims=True)              # (B, 1)
        var = (s2 - s1 * s1 * (1.0 / m)) * (1.0 / (m - 1.0))
        loss4_sum = jnp.sum(jnp.sqrt(var))                        # scalar

        # ---- Stateful batch walk (SignalSimilarity + SignalDifferenceLoss) -
        # Per-class running state lives in vregs as a loop-carried value (no
        # scratch, no warm copy); written back once to the aliased output.
        back = back0_ref[...]                                     # (NC, D)
        cmap = cmap_ref[...]                                      # (NC, D) int32
        acc2 = jnp.zeros((NC, D), jnp.float32)                    # (sig-back[lbl])^2
        acc3 = jnp.zeros((NC, D), jnp.float32)                    # exp(-|sig-back[j]|), j!=lbl
        # B is small & static -> unrolled.  For large B switch to
        # lax.fori_loop with (back, acc2, acc3) as carries and pl.ds slices;
        # for large NC chunk the class axis to bound the (NC, D) working set.
        for i in range(B):
            label = labels_ref[i]                                 # scalar from SMEM
            sig = signal[i:i + 1, :]                              # (1, D) static slice
            onehot = cmap == label                                # (NC, D) bool
            d_all = sig - back                                    # (NC, D)
            e_all = jnp.exp(-jnp.abs(d_all))                      # EUP, computed once
            # loss2: only the label row contributes (masked select, no reduce).
            acc2 = acc2 + jnp.where(onehot, d_all * d_all, 0.0)
            # loss3: masked exclusion of the label class (no subtraction).
            acc3 = acc3 + jnp.where(onehot, 0.0, e_all)
            # SignalSimilarity state update (back_signal_len == 0):
            # back[label] = signal + 1, as an elementwise select.
            back = jnp.where(onehot, sig + 1.0, back)

        total = (0.2 * inv_n * jnp.sum(acc2)      # loss2: mse vs back[label]
                 + jnp.sum(acc3)                  # loss3: difference loss
                 + 0.2 * loss4_sum)               # loss4: smoothness
        loss_ref[...] = jnp.reshape(total, (1, 1))                # single store
        back_ref[...] = back                                      # carried state out

    return kernel


def denoise_builder_loss(x, labels, w, b, back_init):
    """Total batch loss + updated per-class state (warm-state semantics)."""
    B, C, L = x.shape
    NC = back_init.shape[0]
    D = C * L

    # Lane-dense layout: fold channels into the lane axis.
    x_flat = x.reshape(B, D)
    # Per-channel Linear as one block-diagonal weight (host-side, free).
    wbig_t = jnp.kron(jnp.eye(C, dtype=w.dtype), w.T)             # (D, D)
    b_big = jnp.tile(b, C).reshape(1, D)
    # Valid-position mask for the centered 2nd difference (no cross-channel).
    pos = np.arange(D) % L
    d2_mask = jnp.asarray(((pos >= 1) & (pos <= L - 2)).astype(np.float32)).reshape(1, D)
    # Class-id map for one-hot selects (avoids dynamic value indexing).
    class_map = jnp.tile(jnp.arange(NC, dtype=jnp.int32).reshape(NC, 1), (1, D))
    back0 = back_init.reshape(NC, D)

    kernel = _make_kernel(B, C, L, NC, D)
    loss, back_out = pl.pallas_call(
        kernel,
        out_shape=(jax.ShapeDtypeStruct((1, 1), jnp.float32),
                   jax.ShapeDtypeStruct((NC, D), jnp.float32)),
        in_specs=[
            pl.BlockSpec(memory_space=pltpu.MemorySpace.SMEM),    # labels (scalars)
            pl.BlockSpec(memory_space=pltpu.MemorySpace.VMEM),    # x, lane-dense
            pl.BlockSpec(memory_space=pltpu.MemorySpace.VMEM),    # block-diag W^T
            pl.BlockSpec(memory_space=pltpu.MemorySpace.VMEM),    # tiled bias
            pl.BlockSpec(memory_space=pltpu.MemorySpace.VMEM),    # 2nd-diff mask
            pl.BlockSpec(memory_space=pltpu.MemorySpace.VMEM),    # class-id map
            pl.BlockSpec(memory_space=pltpu.MemorySpace.VMEM),    # warm back state
        ],
        out_specs=(pl.BlockSpec(memory_space=pltpu.MemorySpace.VMEM),
                   pl.BlockSpec(memory_space=pltpu.MemorySpace.VMEM)),
        # State is updated in place: warm-state input aliases the state output.
        input_output_aliases={6: 1},
        # Tiny here; for realistic NC*C*L (esp. v7x, 64 MiB VMEM) reintroduce a
        # grid over B / the class axis and re-derive this budget.
        compiler_params=pltpu.CompilerParams(vmem_limit_bytes=32 * 1024 * 1024),
    )(labels.astype(jnp.int32), x_flat, wbig_t, b_big, d2_mask, class_map, back0)
    return loss[0, 0], back_out.reshape(NC, C, L)


def reference_loss(x, labels, w, b, back_init):
    """Pure-JAX replica of the PyTorch DenoiseBuilder.forward (warm state)."""
    back = back_init
    total = jnp.float32(0.0)
    for i in range(x.shape[0]):
        xi = x[i]
        lbl = int(labels[i])
        noise = jnp.dot(xi, w.T, precision=jax.lax.Precision.HIGHEST) + b
        signal = xi - noise
        loss2 = jnp.mean((signal - back[lbl]) ** 2)
        loss3 = jnp.float32(0.0)
        for j in range(back.shape[0]):
            if j != lbl:
                loss3 = loss3 + jnp.sum(jnp.exp(-jnp.abs(signal - back[j])))
        d2 = jnp.diff(signal, 2, axis=-1)
        loss4 = jnp.std(d2, ddof=1)
        total = total + 0.2 * loss2 + loss3 + 0.2 * loss4
        back = back.at[lbl].set(signal + 1.0)
    return total, back


if __name__ == "__main__":
    B, C, L, NUM_CLASSES = 4, 8, 16, 3      # C*L = 128 -> lane-dense rows

    key = jax.random.PRNGKey(0)
    kx, kw, kb, kback = jax.random.split(key, 4)

    x = jax.random.normal(kx, (B, C, L), dtype=jnp.float32)
    bound = 1.0 / np.sqrt(L)                # nn.Linear-style init
    w = jax.random.uniform(kw, (L, L), minval=-bound, maxval=bound,
                           dtype=jnp.float32)
    b = jax.random.uniform(kb, (L,), minval=-bound, maxval=bound,
                           dtype=jnp.float32)
    back_init = jax.random.normal(kback, (NUM_CLASSES, C, L), dtype=jnp.float32)
    labels = jnp.array([0, 2, 1, 0], dtype=jnp.int32)  # repeats hit updated state

    # Reference first (the kernel call aliases/donates the state buffer).
    ref_total, ref_back = reference_loss(x, labels, w, b, back_init)
    ref_total = jax.block_until_ready(ref_total)

    loss, back_final = denoise_builder_loss(x, labels, w, b, back_init)
    loss = jax.block_until_ready(loss)
    back_final = jax.block_until_ready(back_final)

    assert np.isfinite(float(loss))
    # Tolerance accounts for DEFAULT (possibly bf16-truncated) matmul in the
    # kernel vs the HIGHEST-precision reference, plus deferred-sum reassociation.
    np.testing.assert_allclose(float(loss), float(ref_total), rtol=2e-3, atol=1e-2)
    np.testing.assert_allclose(np.asarray(back_final), np.asarray(ref_back),
                               rtol=1e-2, atol=5e-2)
    print("KERNEL_OK")
</pallas_src>

<mosaic_0001>
module attributes {stable_mosaic.version = 11 : i64} {
  func.func @kernel(%arg0: memref<4xi32, #tpu.memory_space<smem>>, %arg1: memref<4x128xf32, #tpu.memory_space<vmem>>, %arg2: memref<128x128xf32, #tpu.memory_space<vmem>>, %arg3: memref<1x128xf32, #tpu.memory_space<vmem>>, %arg4: memref<1x128xf32, #tpu.memory_space<vmem>>, %arg5: memref<3x128xi32, #tpu.memory_space<vmem>>, %arg6: memref<3x128xf32, #tpu.memory_space<vmem>>, %arg7: memref<1x1xf32, #tpu.memory_space<vmem>>, %arg8: memref<3x128xf32, #tpu.memory_space<vmem>>) attributes {dimension_semantics = [], scalar_prefetch = 0 : i64, scratch_operands = 0 : i64, tpu.core_type = #tpu.core_type<tc>} {
    %c0 = arith.constant 0 : index
    %c0_0 = arith.constant 0 : index
    %0 = vector.load %arg1[%c0, %c0_0] : memref<4x128xf32, #tpu.memory_space<vmem>>, vector<4x128xf32>
    %c0_1 = arith.constant 0 : index
    %c0_2 = arith.constant 0 : index
    %1 = vector.load %arg2[%c0_1, %c0_2] : memref<128x128xf32, #tpu.memory_space<vmem>>, vector<128x128xf32>
    %cst = arith.constant dense<0.000000e+00> : vector<4x128xf32>
    %2 = tpu.matmul %0, %1, %cst {dimension_numbers = #tpu.dot_dimension_numbers<[1], [0], [0], [1], [0, 0, 1, 1], [], []>} : vector<4x128xf32>, vector<128x128xf32>, vector<4x128xf32> -> vector<4x128xf32>
    %c0_3 = arith.constant 0 : index
    %c0_4 = arith.constant 0 : index
    %3 = vector.load %arg3[%c0_3, %c0_4] : memref<1x128xf32, #tpu.memory_space<vmem>>, vector<1x128xf32>
    %4 = vector.broadcast %3 : vector<1x128xf32> to vector<4x128xf32>
    %5 = arith.addf %2, %4 : vector<4x128xf32>
    %6 = arith.subf %0, %5 : vector<4x128xf32>
    %c1_i32 = arith.constant 1 : i32
    %7 = tpu.dynamic_rotate %6 by %c1_i32 dim 1 : vector<4x128xf32>, i32 -> vector<4x128xf32>
    %c127_i32 = arith.constant 127 : i32
    %8 = tpu.dynamic_rotate %6 by %c127_i32 dim 1 : vector<4x128xf32>, i32 -> vector<4x128xf32>
    %9 = arith.addf %7, %8 : vector<4x128xf32>
    %cst_5 = arith.constant 2.000000e+00 : f32
    %10 = vector.broadcast %cst_5 : f32 to vector<4x128xf32>
    %11 = arith.mulf %10, %6 : vector<4x128xf32>
    %12 = arith.subf %9, %11 : vector<4x128xf32>
    %c0_6 = arith.constant 0 : index
    %c0_7 = arith.constant 0 : index
    %13 = vector.load %arg4[%c0_6, %c0_7] : memref<1x128xf32, #tpu.memory_space<vmem>>, vector<1x128xf32>
    %14 = vector.broadcast %13 : vector<1x128xf32> to vector<4x128xf32>
    %15 = arith.mulf %12, %14 : vector<4x128xf32>
    %cst_8 = arith.constant dense<0.000000e+00> : vector<4xf32>
    %16 = vector.multi_reduction <add>, %15, %cst_8 [1] : vector<4x128xf32> to vector<4xf32>
    %17 = vector.shape_cast %16 : vector<4xf32> to vector<4x1xf32>
    %18 = arith.mulf %15, %15 : vector<4x128xf32>
    %cst_9 = arith.constant dense<0.000000e+00> : vector<4xf32>
    %19 = vector.multi_reduction <add>, %18, %cst_9 [1] : vector<4x128xf32> to vector<4xf32>
    %20 = vector.shape_cast %19 : vector<4xf32> to vector<4x1xf32>
    %21 = arith.mulf %17, %17 : vector<4x1xf32>
    %cst_10 = arith.constant 0.00892857183 : f32
    %22 = vector.broadcast %cst_10 : f32 to vector<4x1xf32>
    %23 = arith.mulf %21, %22 : vector<4x1xf32>
    %24 = arith.subf %20, %23 : vector<4x1xf32>
    %cst_11 = arith.constant 0.00900900922 : f32
    %25 = vector.broadcast %cst_11 : f32 to vector<4x1xf32>
    %26 = arith.mulf %24, %25 : vector<4x1xf32>
    %27 = math.sqrt %26 : vector<4x1xf32>
    %28 = vector.shape_cast %27 : vector<4x1xf32> to vector<1x4x1xf32>
    %cst_12 = arith.constant dense<0.000000e+00> : vector<1xf32>
    %29 = vector.multi_reduction <add>, %28, %cst_12 [1, 2] : vector<1x4x1xf32> to vector<1xf32>
    %30 = vector.shape_cast %29 : vector<1xf32> to vector<1x1x1xf32>
    %31 = vector.extract %30[0, 0, 0] : f32 from vector<1x1x1xf32>
    %c0_13 = arith.constant 0 : index
    %c0_14 = arith.constant 0 : index
    %32 = vector.load %arg6[%c0_13, %c0_14] : memref<3x128xf32, #tpu.memory_space<vmem>>, vector<3x128xf32>
    %c0_15 = arith.constant 0 : index
    %c0_16 = arith.constant 0 : index
    %33 = vector.load %arg5[%c0_15, %c0_16] : memref<3x128xi32, #tpu.memory_space<vmem>>, vector<3x128xi32>
    %cst_17 = arith.constant 0.000000e+00 : f32
    %34 = vector.broadcast %cst_17 : f32 to vector<3x128xf32>
    %cst_18 = arith.constant 0.000000e+00 : f32
    %35 = vector.broadcast %cst_18 : f32 to vector<3x128xf32>
    %c0_19 = arith.constant 0 : index
    %36 = memref.load %arg0[%c0_19] : memref<4xi32, #tpu.memory_space<smem>>
    %37 = vector.extract_strided_slice %6 {offsets = [0, 0], sizes = [1, 128], strides = [1, 1]} : vector<4x128xf32> to vector<1x128xf32>
    %38 = vector.broadcast %36 : i32 to vector<3x128xi32>
    %39 = arith.cmpi eq, %33, %38 : vector<3x128xi32>
    %40 = vector.broadcast %37 : vector<1x128xf32> to vector<3x128xf32>
    %41 = arith.subf %40, %32 : vector<3x128xf32>
    %42 = math.absf %41 : vector<3x128xf32>
    %cst_20 = arith.constant 0.000000e+00 : f32
    %43 = vector.broadcast %cst_20 : f32 to vector<3x128xf32>
    %44 = arith.subf %43, %42 : vector<3x128xf32>
    %45 = math.exp %44 : vector<3x128xf32>
    %46 = arith.mulf %41, %41 : vector<3x128xf32>
    %cst_21 = arith.constant 0.000000e+00 : f32
    %47 = vector.broadcast %cst_21 : f32 to vector<3x128xf32>
    %48 = arith.select %39, %46, %47 : vector<3x128xi1>, vector<3x128xf32>
    %49 = arith.addf %34, %48 : vector<3x128xf32>
    %cst_22 = arith.constant 0.000000e+00 : f32
    %50 = vector.broadcast %cst_22 : f32 to vector<3x128xf32>
    %51 = arith.select %39, %50, %45 : vector<3x128xi1>, vector<3x128xf32>
    %52 = arith.addf %35, %51 : vector<3x128xf32>
    %cst_23 = arith.constant 1.000000e+00 : f32
    %53 = vector.broadcast %cst_23 : f32 to vector<1x128xf32>
    %54 = arith.addf %37, %53 : vector<1x128xf32>
    %55 = vector.shape_cast %54 : vector<1x128xf32> to vector<1x128xf32>
    %56 = vector.broadcast %55 : vector<1x128xf32> to vector<3x128xf32>
    %57 = arith.select %39, %56, %32 : vector<3x128xi1>, vector<3x128xf32>
    %c1 = arith.constant 1 : index
    %58 = memref.load %arg0[%c1] : memref<4xi32, #tpu.memory_space<smem>>
    %59 = vector.extract_strided_slice %6 {offsets = [1, 0], sizes = [1, 128], strides = [1, 1]} : vector<4x128xf32> to vector<1x128xf32>
    %60 = vector.broadcast %58 : i32 to vector<3x128xi32>
    %61 = arith.cmpi eq, %33, %60 : vector<3x128xi32>
    %62 = vector.broadcast %59 : vector<1x128xf32> to vector<3x128xf32>
    %63 = arith.subf %62, %57 : vector<3x128xf32>
    %64 = math.absf %63 : vector<3x128xf32>
    %cst_24 = arith.constant 0.000000e+00 : f32
    %65 = vector.broadcast %cst_24 : f32 to vector<3x128xf32>
    %66 = arith.subf %65, %64 : vector<3x128xf32>
    %67 = math.exp %66 : vector<3x128xf32>
    %68 = arith.mulf %63, %63 : vector<3x128xf32>
    %cst_25 = arith.constant 0.000000e+00 : f32
    %69 = vector.broadcast %cst_25 : f32 to vector<3x128xf32>
    %70 = arith.select %61, %68, %69 : vector<3x128xi1>, vector<3x128xf32>
    %71 = arith.addf %49, %70 : vector<3x128xf32>
    %cst_26 = arith.constant 0.000000e+00 : f32
    %72 = vector.broadcast %cst_26 : f32 to vector<3x128xf32>
    %73 = arith.select %61, %72, %67 : vector<3x128xi1>, vector<3x128xf32>
    %74 = arith.addf %52, %73 : vector<3x128xf32>
    %cst_27 = arith.constant 1.000000e+00 : f32
    %75 = vector.broadcast %cst_27 : f32 to vector<1x128xf32>
    %76 = arith.addf %59, %75 : vector<1x128xf32>
    %77 = vector.shape_cast %76 : vector<1x128xf32> to vector<1x128xf32>
    %78 = vector.broadcast %77 : vector<1x128xf32> to vector<3x128xf32>
    %79 = arith.select %61, %78, %57 : vector<3x128xi1>, vector<3x128xf32>
    %c2 = arith.constant 2 : index
    %80 = memref.load %arg0[%c2] : memref<4xi32, #tpu.memory_space<smem>>
    %81 = vector.extract_strided_slice %6 {offsets = [2, 0], sizes = [1, 128], strides = [1, 1]} : vector<4x128xf32> to vector<1x128xf32>
    %82 = vector.broadcast %80 : i32 to vector<3x128xi32>
    %83 = arith.cmpi eq, %33, %82 : vector<3x128xi32>
    %84 = vector.broadcast %81 : vector<1x128xf32> to vector<3x128xf32>
    %85 = arith.subf %84, %79 : vector<3x128xf32>
    %86 = math.absf %85 : vector<3x128xf32>
    %cst_28 = arith.constant 0.000000e+00 : f32
    %87 = vector.broadcast %cst_28 : f32 to vector<3x128xf32>
    %88 = arith.subf %87, %86 : vector<3x128xf32>
    %89 = math.exp %88 : vector<3x128xf32>
    %90 = arith.mulf %85, %85 : vector<3x128xf32>
    %cst_29 = arith.constant 0.000000e+00 : f32
    %91 = vector.broadcast %cst_29 : f32 to vector<3x128xf32>
    %92 = arith.select %83, %90, %91 : vector<3x128xi1>, vector<3x128xf32>
    %93 = arith.addf %71, %92 : vector<3x128xf32>
    %cst_30 = arith.constant 0.000000e+00 : f32
    %94 = vector.broadcast %cst_30 : f32 to vector<3x128xf32>
    %95 = arith.select %83, %94, %89 : vector<3x128xi1>, vector<3x128xf32>
    %96 = arith.addf %74, %95 : vector<3x128xf32>
    %cst_31 = arith.constant 1.000000e+00 : f32
    %97 = vector.broadcast %cst_31 : f32 to vector<1x128xf32>
    %98 = arith.addf %81, %97 : vector<1x128xf32>
    %99 = vector.shape_cast %98 : vector<1x128xf32> to vector<1x128xf32>
    %100 = vector.broadcast %99 : vector<1x128xf32> to vector<3x128xf32>
    %101 = arith.select %83, %100, %79 : vector<3x128xi1>, vector<3x128xf32>
    %c3 = arith.constant 3 : index
    %102 = memref.load %arg0[%c3] : memref<4xi32, #tpu.memory_space<smem>>
    %103 = vector.extract_strided_slice %6 {offsets = [3, 0], sizes = [1, 128], strides = [1, 1]} : vector<4x128xf32> to vector<1x128xf32>
    %104 = vector.broadcast %102 : i32 to vector<3x128xi32>
    %105 = arith.cmpi eq, %33, %104 : vector<3x128xi32>
    %106 = vector.broadcast %103 : vector<1x128xf32> to vector<3x128xf32>
    %107 = arith.subf %106, %101 : vector<3x128xf32>
    %108 = math.absf %107 : vector<3x128xf32>
    %cst_32 = arith.constant 0.000000e+00 : f32
    %109 = vector.broadcast %cst_32 : f32 to vector<3x128xf32>
    %110 = arith.subf %109, %108 : vector<3x128xf32>
    %111 = math.exp %110 : vector<3x128xf32>
    %112 = arith.mulf %107, %107 : vector<3x128xf32>
    %cst_33 = arith.constant 0.000000e+00 : f32
    %113 = vector.broadcast %cst_33 : f32 to vector<3x128xf32>
    %114 = arith.select %105, %112, %113 : vector<3x128xi1>, vector<3x128xf32>
    %115 = arith.addf %93, %114 : vector<3x128xf32>
    %cst_34 = arith.constant 0.000000e+00 : f32
    %116 = vector.broadcast %cst_34 : f32 to vector<3x128xf32>
    %117 = arith.select %105, %116, %111 : vector<3x128xi1>, vector<3x128xf32>
    %118 = arith.addf %96, %117 : vector<3x128xf32>
    %cst_35 = arith.constant 1.000000e+00 : f32
    %119 = vector.broadcast %cst_35 : f32 to vector<1x128xf32>
    %120 = arith.addf %103, %119 : vector<1x128xf32>
    %121 = vector.shape_cast %120 : vector<1x128xf32> to vector<1x128xf32>
    %122 = vector.broadcast %121 : vector<1x128xf32> to vector<3x128xf32>
    %123 = arith.select %105, %122, %101 : vector<3x128xi1>, vector<3x128xf32>
    %124 = vector.shape_cast %115 : vector<3x128xf32> to vector<1x3x128xf32>
    %cst_36 = arith.constant dense<0.000000e+00> : vector<1xf32>
    %125 = vector.multi_reduction <add>, %124, %cst_36 [1, 2] : vector<1x3x128xf32> to vector<1xf32>
    %126 = vector.shape_cast %125 : vector<1xf32> to vector<1x1x1xf32>
    %127 = vector.extract %126[0, 0, 0] : f32 from vector<1x1x1xf32>
    %cst_37 = arith.constant 1.562500e-03 : f32
    %128 = arith.mulf %cst_37, %127 : f32
    %129 = vector.shape_cast %118 : vector<3x128xf32> to vector<1x3x128xf32>
    %cst_38 = arith.constant dense<0.000000e+00> : vector<1xf32>
    %130 = vector.multi_reduction <add>, %129, %cst_38 [1, 2] : vector<1x3x128xf32> to vector<1xf32>
    %131 = vector.shape_cast %130 : vector<1xf32> to vector<1x1x1xf32>
    %132 = vector.extract %131[0, 0, 0] : f32 from vector<1x1x1xf32>
    %133 = arith.addf %128, %132 : f32
    %cst_39 = arith.constant 2.000000e-01 : f32
    %134 = arith.mulf %cst_39, %31 : f32
    %135 = arith.addf %133, %134 : f32
    %136 = vector.broadcast %135 : f32 to vector<1x1xf32>
    %c0_40 = arith.constant 0 : index
    %c0_41 = arith.constant 0 : index
    %137 = vector.load %arg7[%c0_40, %c0_41] : memref<1x1xf32, #tpu.memory_space<vmem>>, vector<1x1xf32>
    tpu.vector_store %arg7[%c0_40, %c0_41], %136 {strides = array<i32>} : memref<1x1xf32, #tpu.memory_space<vmem>>, vector<1x1xf32>,
    %c0_42 = arith.constant 0 : index
    %c0_43 = arith.constant 0 : index
    %138 = vector.load %arg8[%c0_42, %c0_43] : memref<3x128xf32, #tpu.memory_space<vmem>>, vector<3x128xf32>
    tpu.vector_store %arg8[%c0_42, %c0_43], %123 {strides = array<i32>} : memref<3x128xf32, #tpu.memory_space<vmem>>, vector<3x128xf32>,
    return
  }
}

</mosaic_0001>

<bundles_post_ra>
// kernel: tpu_custom_call.1
= control target key start
LH: loop header
LB: loop body
LE: loop exit
PB: predicated region body
PF: predicated region fallthrough
CT: control target
= control target key end

     0   :  { %14 = vsyncpa [#allocation5], 0  ;;  %s679_s0 = inlined_call_operand.vmem [shape: s32[4], index: 0, kind: input, shape index: {}]   ;;  %s680_s1 = inlined_call_operand.vmem [shape: f32[4,128], index: 1, kind: input, shape index: {}]   ;;  %s681_s2 = inlined_call_operand.hbm [shape: f32[128,128], index: 2, kind: input, shape index: {}]   ;;  %s682_s3 = inlined_call_operand.vmem [shape: f32[1,128], index: 3, kind: input, shape index: {}]   ;;  %s683_s4 = inlined_call_operand.vmem [shape: f32[1,128], index: 4, kind: input, shape index: {}]   ;;  %s684_s5 = inlined_call_operand.vmem [shape: s32[3,128], index: 5, kind: input, shape index: {}]   ;;  %s685_s6 = inlined_call_operand.hbm [shape: f32[3,128], index: 6, kind: input, shape index: {}, may-alias: {6,8}]   ;;  %s686_s7 = inlined_call_operand.hbm [shape: f32[1,1], index: 7, kind: output, shape index: {0}]   ;;  %s687_s8 = inlined_call_operand.hbm [shape: f32[3,128], index: 8, kind: output, shape index: {1}, may-alias: {6,8}]  }
   0x1   :  { %15 = vsyncpa [#allocation3], 0 }
   0x2   :  { %16 = vsyncpa [#allocation8], 0 }
   0x3   :  { %17 = vsyncpa [#allocation4], 0 }
   0x4   :  { %18 = vsyncpa [#allocation11], 0  ;;  %s25_s29 = sshll.u32 %s679_s0, 4  ;;  %s26_s29 = int_to_ptr.vmem [resolvable:$true] %s25_s29 }
   0x5   :  { %s444_s30 = scalar_lea.vmem %s26_s29, 16  ;;  %p449_p1 = scmp.lt.s32.totalorder %s26_s29, %s26_s29 }
   0x6   :  { %p445_p0 = scmp.ne.s32.totalorder %s26_s29, %s444_s30  ;;  %p450_p2 = scmp.lt.s32.totalorder %s444_s30, %s444_s30 }
   0x8   :  { %p451_p3 = por %p450_p2, %p449_p1 }
   0xa   :  { %p452_p4 = pnand %p451_p3, %p445_p0 }
   0xc   :  { %455 = shalt.err (!%p452_p4)
}
   0xd   :  { %s546_s9 = smov [#allocation2]   ;;  %s547_s10 = smov [#allocation6]  }
   0xe   :  { %28 = dma.vmem_to_smem %s26_s29, 16, %s546_s9, [#allocation5]  }
   0xf   :  { %s36_s11 = sshll.u32 %s547_s10, 4  ;;  %s37_s11 = int_to_ptr.vmem [resolvable:$true] %s36_s11 }
  0x10   :  { %s464_s12 = scalar_lea.vmem %s37_s11, 2048  ;;  %p469_p6 = scmp.lt.s32.totalorder %s37_s11, %s37_s11 }
  0x11   :  { %p465_p5 = scmp.ne.s32.totalorder %s37_s11, %s464_s12  ;;  %p470_p7 = scmp.lt.s32.totalorder %s464_s12, %s464_s12 }
  0x13   :  { %p471_p8 = por %p470_p7, %p469_p6 }
  0x15   :  { %p472_p9 = pnand %p471_p8, %p465_p5 }
  0x17   :  { %475 = shalt.err (!%p472_p9)
}
  0x18   :  { %s548_s0 = smov 128   ;;  %s549_s13 = smov 8  }
  0x19   :  { %42 = dma.hbm_to_vmem [thread:$0]  %s681_s2, 2048, %s37_s11, [#allocation3], %s548_s0, %s548_s0, %s549_s13  }
  0x1a   :  { %s550_s16 = smov [#allocation7]  }
  0x1b   :  { %s55_s17 = sshll.u32 %s550_s16, 4  ;;  %s56_s17 = int_to_ptr.vmem [resolvable:$true] %s55_s17 }
  0x1c   :  { %s484_s18 = scalar_lea.vmem %s56_s17, 64  ;;  %p489_p11 = scmp.lt.s32.totalorder %s56_s17, %s56_s17 }
  0x1d   :  { %p485_p10 = scmp.ne.s32.totalorder %s56_s17, %s484_s18  ;;  %p490_p12 = scmp.lt.s32.totalorder %s484_s18, %s484_s18 }
  0x1f   :  { %p491_p13 = por %p490_p12, %p489_p11 }
  0x21   :  { %p492_p0 = pnand %p491_p13, %p485_p10 }
  0x23   :  { %495 = shalt.err (!%p492_p0)
}
  0x24   :  { %58 = dma.hbm_to_vmem [thread:$0]  %s685_s6, 64, %s56_s17, [#allocation8]  }
  0x25   :  { %536 = dma.done.wait [#allocation5], 16  }
  0x26   :  { %537 = vsyncadd [#allocation5], 4294967280 }
  0x27   :  { %538 = dma.done.wait [#allocation3], 2048  }
  0x28   :  { %539 = vsyncadd [#allocation3], 4294965248 }
  0x29   :  { %540 = dma.done.wait [#allocation8], 64  }
  0x2a   :  { %541 = vsyncadd [#allocation8], 4294967232 }
  0x2b   :  { %68 = sfence }
  0x2c   :  { %v85_v0 = vld [vmem:[#allocation6 + $0x78] sm:$0xff]  ;;  %v551_v1 = vmov 0.0   ;;  %v84_v2 = vld [vmem:[#allocation6 + $0x70] sm:$0xff]  ;;  %vm552_vm0 = vmmov 0   ;;  %v83_v3 = vld [vmem:[#allocation6 + $0x68] sm:$0xff]  ;;  %v214_v18 = vlaneseq  ;;  %s211_s21 = sld [smem:[#allocation2]] }
  0x2d   :  { %382 = vmatprep.subr.mxu0 %v551_v1  ;;  %414 = vmatprep.mubr.msk.f32.mxu0 %vm552_vm0, %v551_v1  ;;  %v82_v4 = vld [vmem:[#allocation6 + $0x60] sm:$0xff]  ;;  %v81_v5 = vld [vmem:[#allocation6 + $0x58] sm:$0xff]  ;;  %v80_v6 = vld [vmem:[#allocation6 + $0x50] sm:$0xff]  ;;  %s362_s22 = sld [smem:[#allocation2 + $0x1]]  ;;  %s553_s28 = smov 1   ;;  %vm179_vm5 = vcmask 1043456  }
  0x2e   :  { %383 = vmatpush3.msra.mxu0 %v85_v0  ;;  %v79_v7 = vld [vmem:[#allocation6 + $0x48] sm:$0xff]  ;;  %v78_v8 = vld [vmem:[#allocation6 + $0x40] sm:$0xff]  ;;  %v77_v9 = vld [vmem:[#allocation6 + $0x38] sm:$0xff]  ;;  %s363_s23 = sld [smem:[#allocation2 + $0x2]]  ;;  %v215_v19 = vshrl.u32 %v214_v18, 7  ;;  %vm300_vm6 = vcmask 1042432  }
  0x2f   :  { %384 = vmatprep.subr.mxu0 %v551_v1  ;;  %v76_v10 = vld [vmem:[#allocation6 + $0x30] sm:$0xff]  ;;  %v75_v11 = vld [vmem:[#allocation6 + $0x28] sm:$0xff]  ;;  %v74_v12 = vld [vmem:[#allocation6 + $0x20] sm:$0xff]  ;;  %s364_s24 = sld [smem:[#allocation2 + $0x3]]  ;;  %vm198_vm8 = vcmask 3072  }
  0x30   :  { %385 = vmatpush3.msra.mxu0 %v84_v2  ;;  %v73_v13 = vld [vmem:[#allocation6 + $0x18] sm:$0xff]  ;;  %v72_v14 = vld [vmem:[#allocation6 + $0x10] sm:$0xff]  ;;  %v71_v15 = vld [vmem:[#allocation6 + $0x8] sm:$0xff]  ;;  %v216_v23 = vsub.s32 0, %v215_v19  ;;  %v239_v24 = vsub.s32 1, %v215_v19  ;;  %v261_v26 = vsub.s32 2, %v215_v19 }
  0x31   :  { %386 = vmatprep.subr.mxu0 %v551_v1  ;;  %v70_v16 = vld [vmem:[#allocation6] sm:$0xff]  ;;  %v283_v27 = vsub.s32 3, %v215_v19 }
  0x32   :  { %387 = vmatpush3.msra.mxu0 %v83_v3  ;;  %v69_v17 = vld [vmem:[%s680_s1] sm:$0xf]  ;;  %v212_v30 = vstv %s211_s21 }
  0x33   :  { %388 = vmatprep.subr.mxu0 %v551_v1  ;;  %v360_v20 = vld [vmem:[%s682_s3] ss:$0 sm:$0xff]  ;;  %v235_v32 = vstv %s362_s22  ;;  %s554_s3 = smov 127  }
  0x34   :  { %389 = vmatpush3.msra.mxu0 %v82_v4  ;;  %v210_v29 = vld [vmem:[%s684_s5] sm:$0x7]  ;;  %v257_v33 = vstv %s363_s23 }
  0x35   :  { %390 = vmatprep.subr.mxu0 %v551_v1  ;;  %v209_v31 = vld [vmem:[#allocation7] sm:$0x7]  ;;  %v279_v37 = vstv %s364_s24  ;;  %vm626_vm1 = vcmp.eq.s32.totalorder %v210_v29, %v212_v30  ;;  %vm632_vm2 = vcmp.eq.s32.totalorder %v210_v29, %v235_v32  ;;  %vm636_vm3 = vcmp.eq.s32.totalorder %v210_v29, %v257_v33 }
  0x36   :  { %391 = vmatpush3.msra.mxu0 %v81_v5  ;;  %vm640_vm4 = vcmp.eq.s32.totalorder %v210_v29, %v279_v37 }
  0x37   :  { %392 = vmatprep.subr.mxu0 %v551_v1 }
  0x38   :  { %393 = vmatpush3.msra.mxu0 %v80_v6 }
  0x39   :  { %394 = vmatprep.subr.mxu0 %v551_v1 }
  0x3a   :  { %395 = vmatpush3.msra.mxu0 %v79_v7 }
  0x3b   :  { %396 = vmatprep.subr.mxu0 %v551_v1 }
  0x3c   :  { %397 = vmatpush3.msra.mxu0 %v78_v8 }
  0x3d   :  { %398 = vmatprep.subr.mxu0 %v551_v1 }
  0x3e   :  { %399 = vmatpush3.msra.mxu0 %v77_v9 }
  0x3f   :  { %400 = vmatprep.subr.mxu0 %v551_v1 }
  0x40   :  { %401 = vmatpush3.msra.mxu0 %v76_v10 }
  0x41   :  { %402 = vmatprep.subr.mxu0 %v551_v1 }
  0x42   :  { %403 = vmatpush3.msra.mxu0 %v75_v11 }
  0x43   :  { %404 = vmatprep.subr.mxu0 %v551_v1 }
  0x44   :  { %405 = vmatpush3.msra.mxu0 %v74_v12 }
  0x45   :  { %406 = vmatprep.subr.mxu0 %v551_v1 }
  0x46   :  { %407 = vmatpush3.msra.mxu0 %v73_v13 }
  0x47   :  { %408 = vmatprep.subr.mxu0 %v551_v1 }
  0x48   :  { %409 = vmatpush3.msra.mxu0 %v72_v14 }
  0x49   :  { %410 = vmatprep.subr.mxu0 %v551_v1 }
  0x4a   :  { %411 = vmatpush3.msra.mxu0 %v71_v15 }
  0x4b   :  { %412 = vmatprep.subr.mxu0 %v551_v1 }
  0x4c   :  { %413 = vmatpush3.msra.mxu0 %v70_v16 }
  0x4d   :  { %415 = vmatmul.mubr.f32.vlgmr.msra.gmra.mxu0 %v69_v17 }
 0x10d   :  { %v159_v21 = vpop.f32.mrf.mxu0 }
 0x10e   :  { %v160_v22 = vadd.f32 %v360_v20, %v159_v21 }
 0x10f   :  { %v416_v25 = vpop.f32.mrf.mxu0 }
 0x110   :  { %v617_v28 = vsub.f32 %v69_v17, %v160_v22 }
 0x112   :  { %164 = vrot.lane.b32.xlu0 %v617_v28, %s553_s28  ;;  %v217_v34 = vrot.slane %v617_v28, %v216_v23  ;;  %v228_v35 = vadd.f32 1.0, %v617_v28  ;;  %v240_v36 = vrot.slane %v617_v28, %v239_v24  ;;  %v262_v39 = vrot.slane %v617_v28, %v261_v26 }
 0x113   :  { %v284_v40 = vrot.slane %v617_v28, %v283_v27  ;;  %v169_v30 = vmul.f32 2.0, %v617_v28 }
 0x114   :  { %v218_v41 = vsub.f32 %v217_v34, %v209_v31  ;;  %v232_v42 = vrot.slane %v228_v35, %v216_v23  ;;  %v254_v44 = vrot.slane %v228_v35, %v239_v24  ;;  %v276_v50 = vrot.slane %v228_v35, %v261_v26 }
 0x115   :  { %v298_v53 = vrot.slane %v228_v35, %v283_v27 }
 0x116   :  { %166 = vrot.lane.b32.xlu0 %v617_v28, %s554_s3  ;;  %v219_v47 = vand.u32 2147483647, %v218_v41  ;;  %v223_v48 = vmul.f32 %v218_v41, %v218_v41  ;;  %v233_v49 = vsel %vm626_vm1, %v232_v42, %v209_v31  ;;  %v361_v31 = vld [vmem:[%s683_s4] ss:$0 sm:$0xff]  ;;  %s555_s4 = smov [#allocation10]  }
 0x117   :  { %v241_v51 = vsub.f32 %v240_v36, %v233_v49  ;;  %v255_v52 = vsel %vm632_vm2, %v254_v44, %v233_v49  ;;  %s345_s30 = sshll.u32 %s555_s4, 4  ;;  %s346_s30 = int_to_ptr.vmem [resolvable:$true] %s345_s30 }
 0x118   :  { %v220_v54 = vsub.f32 0.0, %v219_v47  ;;  %v224_v55 = vsel %vm626_vm1, %v223_v48, 0.0  ;;  %v263_v56 = vsub.f32 %v262_v39, %v255_v52  ;;  %v277_v57 = vsel %vm636_vm3, %v276_v50, %v255_v52  ;;  %s496_s9 = scalar_lea.vmem %s346_s30, 64  ;;  %p501_p2 = scmp.lt.s32.totalorder %s346_s30, %s346_s30 }
 0x119   :  { %v242_v58 = vand.u32 2147483647, %v241_v51  ;;  %v246_v59 = vmul.f32 %v241_v51, %v241_v51  ;;  %v285_v60 = vsub.f32 %v284_v40, %v277_v57  ;;  %v299_v61 = vsel %vm640_vm4, %v298_v53, %v277_v57  ;;  %p497_p1 = scmp.ne.s32.totalorder %s346_s30, %s496_s9  ;;  %p502_p3 = scmp.lt.s32.totalorder %s496_s9, %s496_s9 }
 0x11a   :  { %v221_v62 = vmul.f32 1.442695, %v220_v54  ;;  %v264_v63 = vand.u32 2147483647, %v263_v56  ;;  %v268_v0 = vmul.f32 %v263_v56, %v263_v56  ;;  %328 = vst [vmem:[#allocation10] sm:$0x7] %v299_v61 }
 0x11b   :  { %v243_v1 = vsub.f32 0.0, %v242_v58  ;;  %v247_v2 = vsel %vm632_vm2, %v246_v59, 0.0  ;;  %v286_v3 = vand.u32 2147483647, %v285_v60  ;;  %v290_v4 = vmul.f32 %v285_v60, %v285_v60  ;;  %p503_p4 = por %p502_p3, %p501_p2 }
 0x11c   :  { %434 = vpow2.f32 %v221_v62  ;;  %v248_v5 = vadd.f32 %v247_v2, %v224_v55  ;;  %v265_v6 = vsub.f32 0.0, %v264_v63  ;;  %v269_v7 = vsel %vm636_vm3, %v268_v0, 0.0 }
 0x11d   :  { %v244_v8 = vmul.f32 1.442695, %v243_v1  ;;  %v287_v9 = vsub.f32 0.0, %v286_v3  ;;  %v291_v10 = vsel %vm640_vm4, %v290_v4, 0.0  ;;  %p504_p5 = pnand %p503_p4, %p497_p1 }
 0x11e   :  { %v266_v11 = vmul.f32 1.442695, %v265_v6  ;;  %v270_v12 = vadd.f32 %v269_v7, %v248_v5 }
 0x11f   :  { %436 = vpow2.f32 %v244_v8  ;;  %v288_v13 = vmul.f32 1.442695, %v287_v9 }
 0x120   :  { %438 = vpow2.f32 %v266_v11  ;;  %v292_v14 = vadd.f32 %v291_v10, %v270_v12 }
 0x121   :  { %440 = vpow2.f32 %v288_v13 }
 0x122   :  { %v301_v37 = vsel %vm300_vm6, %v292_v14, 0.0 }
 0x129   :  { %v435_v15 = vpop.eup %434 }
 0x12a   :  { %v226_v16 = vsel %vm626_vm1, 0.0, %v435_v15 }
 0x12c   :  { %v437_v17 = vpop.eup %436 }
 0x12d   :  { %v439_v18 = vpop.eup %438  ;;  %v249_v19 = vsel %vm632_vm2, 0.0, %v437_v17 }
 0x12e   :  { %v441_v20 = vpop.eup %440  ;;  %v250_v21 = vadd.f32 %v249_v19, %v226_v16  ;;  %v271_v22 = vsel %vm636_vm3, 0.0, %v439_v18 }
 0x12f   :  { %v293_v23 = vsel %vm640_vm4, 0.0, %v441_v20 }
 0x130   :  { %v272_v24 = vadd.f32 %v271_v22, %v250_v21 }
 0x132   :  { %v294_v25 = vadd.f32 %v293_v23, %v272_v24 }
 0x134   :  { %v312_v38 = vsel %vm300_vm6, %v294_v25, 0.0 }
 0x184   :  { %v165_v26 = vpop.permute.xlu0 %164 }
 0x188   :  { %v167_v27 = vpop.permute.xlu0 %166 }
 0x189   :  { %v168_v29 = vadd.f32 %v167_v27, %v165_v26 }
 0x18b   :  { %v170_v32 = vsub.f32 %v168_v29, %v169_v30 }
 0x18d   :  { %v178_v33 = vmul.f32 %v361_v31, %v170_v32 }
 0x18f   :  { %v180_v34 = vsel %vm179_vm5, %v178_v33, 0.0  ;;  %v183_v35 = vmul.f32 %v178_v33, %v178_v33 }
 0x190   :  { %181 = vadd.xlane.f32.xlu1 %v180_v34 }
 0x191   :  { %v184_v36 = vsel %vm179_vm5, %v183_v35, 0.0 }
 0x194   :  { %185 = vadd.xlane.f32.xlu1 %v184_v36 }
 0x198   :  { %302 = vadd.xlane.f32.xlu1 %v301_v37 }
 0x19c   :  { %313 = vadd.xlane.f32.xlu1 %v312_v38 }
 0x219   :  { %v182_v39 = vpop.xlane.xlu1 %181 }
 0x21a   :  { %v187_v40 = vmul.f32 %v182_v39, %v182_v39 }
 0x21c   :  { %v188_v28 = vmul.f32 0.008928572, %v187_v40 }
 0x21d   :  { %v186_v41 = vpop.xlane.xlu1 %185 }
 0x21e   :  { %v189_v42 = vsub.f32 %v186_v41, %v188_v28 }
 0x220   :  { %v190_v43 = vmul.f32 0.009009009, %v189_v42 }
 0x222   :  { %442 = vrsqrt.f32 %v190_v43  ;;  %vm193_vm7 = vcmp.eq.f32.partialorder %v190_v43, inf  ;;  %v196_v46 = vand.u32 2147483648, %v190_v43  ;;  %vm195_vm9 = vcmp.eq.f32.partialorder %v190_v43, 0.0 }
 0x22f   :  { %v443_v44 = vpop.eup %442 }
 0x230   :  { %v192_v45 = vmul.f32 %v443_v44, %v190_v43 }
 0x232   :  { %v194_v47 = vsel %vm193_vm7, %v190_v43, %v192_v45 }
 0x233   :  { %v197_v48 = vsel %vm195_vm9, %v196_v46, %v194_v47 }
 0x234   :  { %v199_v49 = vsel %vm198_vm8, %v197_v48, 0.0 }
 0x235   :  { %200 = vadd.xlane.f32.xlu0 %v199_v49 }
 0x236   :  { %507 = shalt.err (!%p504_p5)
}
 0x237   :  { %348 = dma.vmem_to_hbm [thread:$0]  %s346_s30, 64, %s687_s8, [#allocation11]   ;;  %v303_v50 = vpop.xlane.xlu1 %302  ;;  %vm326_vm10 = vcmask 0  }
 0x238   :  { %v304_v52 = vrot.slane %v303_v50, 4  ;;  %s556_s14 = smov [#allocation9]  }
 0x239   :  { %s335_s15 = sshll.u32 %s556_s14, 4  ;;  %s336_s15 = int_to_ptr.vmem [resolvable:$true] %s335_s15 }
 0x23a   :  { %v305_v54 = vadd.f32 %v304_v52, %v303_v50  ;;  %s516_s19 = scalar_lea.vmem %s336_s15, 16  ;;  %s520_s20 = scalar_lea.vmem %s336_s15, 32 }
 0x23b   :  { %v314_v51 = vpop.xlane.xlu1 %313  ;;  %p517_p6 = scmp.ne.s32.totalorder %s336_s15, %s516_s19  ;;  %p521_p7 = scmp.lt.s32.totalorder %s336_s15, %s336_s15 }
 0x23c   :  { %v315_v53 = vrot.slane %v314_v51, 4  ;;  %v306_v56 = vrot.slane %v305_v54, 2  ;;  %p522_p8 = scmp.lt.s32.totalorder %s520_s20, %s516_s19 }
 0x23e   :  { %v316_v55 = vadd.f32 %v315_v53, %v314_v51  ;;  %v307_v61 = vadd.f32 %v306_v56, %v305_v54  ;;  %p523_p9 = por %p522_p8, %p521_p7 }
 0x240   :  { %v317_v58 = vrot.slane %v316_v55, 2  ;;  %v308_v1 = vrot.slane %v307_v61, 1  ;;  %p524_p10 = pnand %p523_p9, %p517_p6 }
 0x242   :  { %v318_v62 = vadd.f32 %v317_v58, %v316_v55  ;;  %v309_v5 = vadd.f32 %v308_v1, %v307_v61 }
 0x244   :  { %v319_v3 = vrot.slane %v318_v62, 1 }
 0x246   :  { %v320_v6 = vadd.f32 %v319_v3, %v318_v62 }
 0x2be   :  { %v201_v57 = vpop.xlane.xlu0 %200 }
 0x2bf   :  { %v202_v59 = vrot.slane %v201_v57, 4 }
 0x2c1   :  { %v203_v60 = vadd.f32 %v202_v59, %v201_v57 }
 0x2c3   :  { %v204_v63 = vrot.slane %v203_v60, 2 }
 0x2c5   :  { %v205_v0 = vadd.f32 %v204_v63, %v203_v60 }
 0x2c7   :  { %v206_v2 = vrot.slane %v205_v0, 1 }
 0x2c9   :  { %v207_v4 = vadd.f32 %v206_v2, %v205_v0 }
 0x2cb   :  { %417 = vpush %v207_v4 }
 0x2cc   :  { %419 = vpush %v309_v5 }
 0x2cd   :  { %421 = vpush %v320_v6 }
 0x2fc   :  { %s418_s8 = spop %417 }
 0x2fd   :  { %s420_s12 = spop %419  ;;  %s323_s16 = smul.f32 0.2, %s418_s8 }
 0x2fe   :  { %s311_s0 = smul.f32 0.0015625, %s420_s12  ;;  %s422_s13 = spop %421 }
 0x300   :  { %s322_s17 = sadd.f32 %s422_s13, %s311_s0 }
 0x302   :  { %s324_s18 = sadd.f32 %s323_s16, %s322_s17 }
 0x304   :  { %v325_v7 = vstv %s324_s18 }
 0x305   :  { %327 = vst.msk [vmem:[#allocation9] sm:$0x1] %vm326_vm10, %v325_v7 }
 0x306   :  { %527 = shalt.err (!%p524_p10)
}
 0x307   :  { %338 = dma.vmem_to_hbm [thread:$0]  %s336_s15, 16, %s686_s7, [#allocation4]  }
 0x308   :  { %542 = dma.done.wait [#allocation4], 16  }
 0x309   :  { %543 = vsyncadd [#allocation4], 4294967280 }
 0x30a   :  { %544 = dma.done.wait [#allocation11], 64  }
 0x30b   :  { %545 = vsyncadd [#allocation11], 4294967232 }
 0x30c   :  { %355 = vsyncpa [#allocation3], 1 }
 0x30d   :  { %356 = vsyncpa [#allocation8], 1 }
 0x30e   :  { %357 = vsyncpa [#allocation4], 1 }
 0x30f   :  { %358 = vsyncpa [#allocation11], 1 }
 0x310   :  { %359 = vsyncpa [#allocation5], 1 }

</bundles_post_ra>
